<compile_context>
chip_gen: v5e
topology: v5e:2x2
jax: 0.10.0
libtpu: 0.0.40
codegen_flags: <defaults>
</compile_context>

<pallas_src>
import jax
import jax.numpy as jnp
from jax.experimental import pallas as pl
from jax.experimental.pallas import tpu as pltpu

_H = 32          # hidden width 30, zero-padded to 32 (sublane-aligned)
_KIN = 8         # input rows: [x, t, 1, 0, 0, 0, 0, 0]
_CARRIER = 20.0  # tanh(20.0) rounds to exactly 1.0f -> constant-one bias carrier


def _mlp_kernel(x_ref, w1_ref, w23_ref, w4_ref, o_ref):
    """One batch tile; batch on the lane axis.

    x_ref:   (8, tm)     rows [x, t, 1, 0...]   (features on sublanes)
    w1_ref:  (32, 8)     [w1 | b1] slab, row 31 = carrier hitting the ones row
    w23_ref: (2, 32, 32) layers 2/3; bias in column 31, carrier at [31, 31]
    w4_ref:  (8, 32)     row 0 = [w4 | 0 | b4], rows 1..7 zero
    o_ref:   (1, tm)     lane-dense output tile
    """
    f32 = jnp.float32
    # Layer 1 (2 -> 30) + b1, fully on the MXU (K = 8; ones row carries b1).
    y = jnp.tanh(jnp.dot(w1_ref[...], x_ref[...], preferred_element_type=f32))
    # Layers 2, 3 (30 -> 30) + biases: (32,32) @ (32,tm); row 31 stays == 1.0.
    y = jnp.tanh(jnp.dot(w23_ref[0], y, preferred_element_type=f32))
    y = jnp.tanh(jnp.dot(w23_ref[1], y, preferred_element_type=f32))
    # Layer 4 (30 -> 1) + b4 as a matmul; only result row 0 is meaningful.
    out = jnp.dot(w4_ref[...], y, preferred_element_type=f32)
    o_ref[...] = out[0:1, :].astype(o_ref.dtype)


def pack_params(p):
    """Zero-pad 30-wide dims to 32 and fold all biases into the contractions.

    Padding is exact: padded row 30 gives tanh(0)=0 activations which multiply
    zero columns; padded row 31 is driven to a pre-activation of 20 by the
    carrier weight against a constant-one input row, so tanh saturates to
    exactly 1.0f and column 31 of each weight slab carries that layer's bias.
    """
    w1 = jnp.zeros((_H, _KIN), jnp.float32)
    w1 = w1.at[:30, :2].set(p["w1"])
    w1 = w1.at[:30, 2].set(p["b1"])
    w1 = w1.at[31, 2].set(_CARRIER)          # row 31 -> tanh(20 * 1) == 1.0

    w23 = jnp.zeros((2, _H, _H), jnp.float32)
    w23 = w23.at[0, :30, :30].set(p["w2"])
    w23 = w23.at[0, :30, 31].set(p["b2"])    # bias * carrier-row (== 1.0)
    w23 = w23.at[0, 31, 31].set(_CARRIER)    # keep the carrier row alive
    w23 = w23.at[1, :30, :30].set(p["w3"])
    w23 = w23.at[1, :30, 31].set(p["b3"])
    w23 = w23.at[1, 31, 31].set(_CARRIER)

    w4 = jnp.zeros((_KIN, _H), jnp.float32)
    w4 = w4.at[0, :30].set(p["w4"][0, :])
    w4 = w4.at[0, 31].set(p["b4"][0])        # b4 * carrier-row (== 1.0)
    return w1, w23, w4


def fisher_kpp_pinn_forward_packed(x_cols, w1_pack, w23_pack, w4_pack, *, tm=8192):
    """x_cols: (2, N) float32, batch on the minor axis. Returns (1, N) float32."""
    two, N = x_cols.shape
    assert two == 2

    # Lane-aligned batch tile; guarantee >=2 grid steps whenever n >= 256 so a
    # ("parallel",) grid can shard across both v7x TensorCores.
    n128 = pl.cdiv(N, 128) * 128
    tm_eff = max(128, (min(tm, n128) // 128) * 128)
    if n128 >= 256:
        tm_eff = min(tm_eff, max(128, (n128 // 2 // 128) * 128))
    n_pad = pl.cdiv(N, tm_eff) * tm_eff

    # (8, n_pad): [x, t, ones, 0, 0, 0, 0, 0] in one concat + pad.  Padded tail
    # lanes produce finite garbage that is sliced off below.
    xt = jnp.concatenate(
        [x_cols.astype(jnp.float32), jnp.ones((1, N), jnp.float32)], axis=0)
    xt = jnp.pad(xt, ((0, _KIN - 3), (0, n_pad - N)))

    out = pl.pallas_call(
        _mlp_kernel,
        out_shape=jax.ShapeDtypeStruct((1, n_pad), jnp.float32),
        grid_spec=pltpu.PrefetchScalarGridSpec(
            num_scalar_prefetch=0,
            grid=(n_pad // tm_eff,),
            in_specs=[
                pl.BlockSpec((_KIN, tm_eff), lambda i: (0, i)),   # x tile
                pl.BlockSpec((_H, _KIN), lambda i: (0, 0)),       # w1|b1 slab
                pl.BlockSpec((2, _H, _H), lambda i: (0, 0, 0)),   # w2/w3 (+bias)
                pl.BlockSpec((_KIN, _H), lambda i: (0, 0)),       # w4|b4 slab
            ],
            out_specs=pl.BlockSpec((1, tm_eff), lambda i: (0, i)),
        ),
        compiler_params=pltpu.CompilerParams(
            dimension_semantics=("parallel",)),   # batch axis shards over TCs
    )(xt, w1_pack, w23_pack, w4_pack)

    return out[:, :N]


def fisher_kpp_pinn_forward(x, params, *, tm=8192):
    """x: (N, 2) float32 (PyTorch layout). Returns (N, 1) float32."""
    N, din = x.shape
    assert din == 2
    w1_pack, w23_pack, w4_pack = pack_params(params)
    out = fisher_kpp_pinn_forward_packed(x.T, w1_pack, w23_pack, w4_pack, tm=tm)
    return out[0].reshape(N, 1)


def init_params(key):
    """Deterministic init mirroring the PyTorch module's __init__.

    Layers 1-3: kaiming_normal_(mode='fan_out', nonlinearity='tanh')
                => std = (5/3) / sqrt(fan_out).
    Layer 4 weight and all biases: PyTorch Linear default
                U(-1/sqrt(fan_in), 1/sqrt(fan_in)).
    Weights kept in PyTorch convention: (out_features, in_features).
    """
    ks = jax.random.split(key, 8)
    gain = 5.0 / 3.0

    def kaiming_w(k, fan_in, fan_out):
        std = gain / jnp.sqrt(jnp.float32(fan_out))
        return std * jax.random.normal(k, (fan_out, fan_in), jnp.float32)

    def uniform_w(k, fan_in, fan_out):
        bound = 1.0 / jnp.sqrt(jnp.float32(fan_in))
        return jax.random.uniform(k, (fan_out, fan_in), jnp.float32, -bound, bound)

    def uniform_b(k, fan_in, fan_out):
        bound = 1.0 / jnp.sqrt(jnp.float32(fan_in))
        return jax.random.uniform(k, (fan_out,), jnp.float32, -bound, bound)

    return {
        "w1": kaiming_w(ks[0], 2, 30),  "b1": uniform_b(ks[1], 2, 30),
        "w2": kaiming_w(ks[2], 30, 30), "b2": uniform_b(ks[3], 30, 30),
        "w3": kaiming_w(ks[4], 30, 30), "b3": uniform_b(ks[5], 30, 30),
        "w4": uniform_w(ks[6], 30, 1),  "b4": uniform_b(ks[7], 30, 1),
    }


def reference_forward(x, p):
    y = jnp.tanh(x @ p["w1"].T + p["b1"])
    y = jnp.tanh(y @ p["w2"].T + p["b2"])
    y = jnp.tanh(y @ p["w3"].T + p["b3"])
    return y @ p["w4"].T + p["b4"]


if __name__ == "__main__":
    key = jax.random.PRNGKey(0)
    k_param, k_x = jax.random.split(key)

    params = init_params(k_param)
    # (x, t) collocation pairs for the PINN: shape (N, 2); any N works thanks
    # to wrapper-side padding.
    N = 64
    x = jax.random.uniform(k_x, (N, 2), jnp.float32, 0.0, 1.0)

    out = fisher_kpp_pinn_forward(x, params)
    out = jax.block_until_ready(out)

    ref = reference_forward(x, params)
    assert out.shape == (N, 1)
    assert jnp.allclose(out, ref, atol=1e-5, rtol=1e-5), "mismatch vs reference"

    print("KERNEL_OK")
</pallas_src>

<mosaic_0001>
module attributes {stable_mosaic.version = 11 : i64} {
  func.func @_mlp_kernel(%arg0: i32, %arg1: memref<8x128xf32, #tpu.memory_space<vmem>>, %arg2: memref<32x8xf32, #tpu.memory_space<vmem>>, %arg3: memref<2x32x32xf32, #tpu.memory_space<vmem>>, %arg4: memref<8x32xf32, #tpu.memory_space<vmem>>, %arg5: memref<1x128xf32, #tpu.memory_space<vmem>>) attributes {dimension_semantics = [#tpu.dimension_semantics<parallel>], iteration_bounds = array<i64: 1>, scalar_prefetch = 0 : i64, scratch_operands = 0 : i64, tpu.core_type = #tpu.core_type<tc>, window_params = [{transform_indices = @transform_0, window_bounds = array<i64: 8, 128>}, {pipeline_mode = #tpu.pipeline_mode<synchronous>, transform_indices = @transform_1, window_bounds = array<i64: 32, 8>}, {pipeline_mode = #tpu.pipeline_mode<synchronous>, transform_indices = @transform_2, window_bounds = array<i64: 2, 32, 32>}, {pipeline_mode = #tpu.pipeline_mode<synchronous>, transform_indices = @transform_3, window_bounds = array<i64: 8, 32>}, {transform_indices = @transform_4, window_bounds = array<i64: 1, 128>}]} {
    %c0 = arith.constant 0 : index
    %c0_0 = arith.constant 0 : index
    %0 = vector.load %arg2[%c0, %c0_0] : memref<32x8xf32, #tpu.memory_space<vmem>>, vector<32x8xf32>
    %c0_1 = arith.constant 0 : index
    %c0_2 = arith.constant 0 : index
    %1 = vector.load %arg1[%c0_1, %c0_2] : memref<8x128xf32, #tpu.memory_space<vmem>>, vector<8x128xf32>
    %cst = arith.constant dense<0.000000e+00> : vector<32x128xf32>
    %2 = tpu.matmul %0, %1, %cst {dimension_numbers = #tpu.dot_dimension_numbers<[1], [0], [0], [1], [0, 0, 1, 1], [], []>} : vector<32x8xf32>, vector<8x128xf32>, vector<32x128xf32> -> vector<32x128xf32>
    %3 = math.tanh %2 : vector<32x128xf32>
    %c0_3 = arith.constant 0 : index
    %c0_4 = arith.constant 0 : index
    %c0_5 = arith.constant 0 : index
    %4 = vector.load %arg3[%c0_3, %c0_4, %c0_5] : memref<2x32x32xf32, #tpu.memory_space<vmem>>, vector<1x32x32xf32>
    %5 = vector.shape_cast %4 : vector<1x32x32xf32> to vector<32x32xf32>
    %cst_6 = arith.constant dense<0.000000e+00> : vector<32x128xf32>
    %6 = tpu.matmul %5, %3, %cst_6 {dimension_numbers = #tpu.dot_dimension_numbers<[1], [0], [0], [1], [0, 0, 1, 1], [], []>} : vector<32x32xf32>, vector<32x128xf32>, vector<32x128xf32> -> vector<32x128xf32>
    %7 = math.tanh %6 : vector<32x128xf32>
    %c1 = arith.constant 1 : index
    %c0_7 = arith.constant 0 : index
    %c0_8 = arith.constant 0 : index
    %8 = vector.load %arg3[%c1, %c0_7, %c0_8] : memref<2x32x32xf32, #tpu.memory_space<vmem>>, vector<1x32x32xf32>
    %9 = vector.shape_cast %8 : vector<1x32x32xf32> to vector<32x32xf32>
    %cst_9 = arith.constant dense<0.000000e+00> : vector<32x128xf32>
    %10 = tpu.matmul %9, %7, %cst_9 {dimension_numbers = #tpu.dot_dimension_numbers<[1], [0], [0], [1], [0, 0, 1, 1], [], []>} : vector<32x32xf32>, vector<32x128xf32>, vector<32x128xf32> -> vector<32x128xf32>
    %11 = math.tanh %10 : vector<32x128xf32>
    %c0_10 = arith.constant 0 : index
    %c0_11 = arith.constant 0 : index
    %12 = vector.load %arg4[%c0_10, %c0_11] : memref<8x32xf32, #tpu.memory_space<vmem>>, vector<8x32xf32>
    %cst_12 = arith.constant dense<0.000000e+00> : vector<8x128xf32>
    %13 = tpu.matmul %12, %11, %cst_12 {dimension_numbers = #tpu.dot_dimension_numbers<[1], [0], [0], [1], [0, 0, 1, 1], [], []>} : vector<8x32xf32>, vector<32x128xf32>, vector<8x128xf32> -> vector<8x128xf32>
    %14 = vector.extract_strided_slice %13 {offsets = [0, 0], sizes = [1, 128], strides = [1, 1]} : vector<8x128xf32> to vector<1x128xf32>
    %c0_13 = arith.constant 0 : index
    %c0_14 = arith.constant 0 : index
    %15 = vector.load %arg5[%c0_13, %c0_14] : memref<1x128xf32, #tpu.memory_space<vmem>>, vector<1x128xf32>
    tpu.vector_store %arg5[%c0_13, %c0_14], %14 {strides = array<i32>} : memref<1x128xf32, #tpu.memory_space<vmem>>, vector<1x128xf32>,
    return
  }
  func.func @transform_0(%arg0: i32) -> (i32, i32) {
    %c0_i32 = arith.constant 0 : i32
    %c0_i32_0 = arith.constant 0 : i32
    return %c0_i32, %arg0 : i32, i32
  }
  func.func @transform_1(%arg0: i32) -> (i32, i32) {
    %c0_i32 = arith.constant 0 : i32
    %c0_i32_0 = arith.constant 0 : i32
    %c0_i32_1 = arith.constant 0 : i32
    return %c0_i32, %c0_i32_0 : i32, i32
  }
  func.func @transform_2(%arg0: i32) -> (i32, i32, i32) {
    %c0_i32 = arith.constant 0 : i32
    %c0_i32_0 = arith.constant 0 : i32
    %c0_i32_1 = arith.constant 0 : i32
    %c0_i32_2 = arith.constant 0 : i32
    return %c0_i32, %c0_i32_0, %c0_i32_1 : i32, i32, i32
  }
  func.func @transform_3(%arg0: i32) -> (i32, i32) {
    %c0_i32 = arith.constant 0 : i32
    %c0_i32_0 = arith.constant 0 : i32
    %c0_i32_1 = arith.constant 0 : i32
    return %c0_i32, %c0_i32_0 : i32, i32
  }
  func.func @transform_4(%arg0: i32) -> (i32, i32) {
    %c0_i32 = arith.constant 0 : i32
    %c0_i32_0 = arith.constant 0 : i32
    return %c0_i32, %arg0 : i32, i32
  }
}

</mosaic_0001>

<bundles_post_ra>
// kernel: tpu_custom_call.1
= control target key start
LH: loop header
LB: loop body
LE: loop exit
PB: predicated region body
PF: predicated region fallthrough
CT: control target
= control target key end

     0   :  { %9 = vsyncpa [#allocation3], 0  ;;  %s390_s0 = inlined_call_operand.vmem [shape: f32[8,128], index: 0, kind: input, shape index: {}]   ;;  %s391_s1 = inlined_call_operand.vmem [shape: f32[32,8], index: 1, kind: input, shape index: {}]   ;;  %s392_s2 = inlined_call_operand.hbm [shape: f32[2,32,32], index: 2, kind: input, shape index: {}]   ;;  %s393_s3 = inlined_call_operand.vmem [shape: f32[8,32], index: 3, kind: input, shape index: {}]   ;;  %s394_s4 = inlined_call_operand.hbm [shape: f32[1,128], index: 4, kind: output, shape index: {}]  }
   0x1   :  { %10 = vsyncpa [#allocation4], 0  ;;  %s19_s17 = sshll.u32 %s392_s2, 4  ;;  %s328_s18 = smov [#allocation2]   ;;  %s20_s17 = int_to_ptr.hbm [resolvable:$true] %s19_s17 }
   0x2   :  { %s21_s19 = sshll.u32 %s328_s18, 4  ;;  %s329_s20 = smov 128   ;;  %s22_s19 = int_to_ptr.vmem [resolvable:$true] %s21_s19 }
   0x3   :  { %s330_s21 = smov 8  }
   0x4   :  { %27 = dma.hbm_to_vmem [thread:$0]  %s20_s17, 1024, %s22_s19, [#allocation3], %s329_s20, %s329_s20, %s330_s21  }
   0x5   :  { %324 = dma.done.wait [#allocation3], 1024  }
   0x6   :  { %325 = vsyncadd [#allocation3], 4294966272  ;;  %vm39_vm0 = vcmask 64512   ;;  %v38_v0 = vld [vmem:[%s390_s0] sm:$0xff]  ;;  %v35_v2 = vld [vmem:[%s391_s1 + $0x8] sm:$0xff]  ;;  %vm89_vm1 = vcmask 261120  }
   0x7   :  { %v34_v1 = vld [vmem:[%s391_s1] sm:$0xff]  ;;  %67 = vmatpush.msra.mxu0 %v38_v0  ;;  %v36_v3 = vld [vmem:[%s391_s1 + $0x10] sm:$0xff]  ;;  %v37_v4 = vld [vmem:[%s391_s1 + $0x18] sm:$0xff]  ;;  %s331_s5 = smov [#allocation5]   ;;  %s217_s9 = sshll.u32 %s394_s4, 4  ;;  %s218_s9 = int_to_ptr.hbm [resolvable:$true] %s217_s9 }
   0x8   :  { %227 = vmatmul.msk.f32.vlgmr.msra.gmra.mxu0 %vm39_vm0, %v34_v1  ;;  %v85_v12 = vld [vmem:[#allocation2] sm:$0xff]  ;;  %v88_v13 = vld [vmem:[#allocation2 + $0x18] sm:$0xff]  ;;  %v86_v15 = vld [vmem:[#allocation2 + $0x8] sm:$0xff]  ;;  %s215_s6 = sshll.u32 %s331_s5, 4  ;;  %s216_s6 = int_to_ptr.vmem [resolvable:$true] %s215_s6 }
   0x9   :  { %v87_v16 = vld [vmem:[#allocation2 + $0x10] sm:$0xff]  ;;  %v136_v24 = vld [vmem:[#allocation2 + $0x20] sm:$0xff]  ;;  %v139_v25 = vld [vmem:[#allocation2 + $0x38] sm:$0xff] }
   0xa   :  { %v137_v27 = vld [vmem:[#allocation2 + $0x28] sm:$0xff]  ;;  %v138_v28 = vld [vmem:[#allocation2 + $0x30] sm:$0xff]  ;;  %v185_v36 = vld [vmem:[%s393_s3] sm:$0xff] }
  0x10   :  { %228 = vmatmul.msk.f32.gmra.mxu0 %vm39_vm0, %v35_v2 }
  0x18   :  { %229 = vmatmul.msk.f32.gmra.mxu0 %vm39_vm0, %v36_v3 }
  0x20   :  { %230 = vmatmul.msk.f32.gmra.mxu0 %vm39_vm0, %v37_v4 }
  0x85   :  { %v69_v5 = vpop.f32.mrf.mxu0 }
  0x8d   :  { %v72_v6 = vpop.f32.mrf.mxu0 }
  0x95   :  { %v75_v7 = vpop.f32.mrf.mxu0 }
  0x9d   :  { %v78_v8 = vpop.f32.mrf.mxu0 }
  0x9e   :  { %252 = vtanh.f32 %v78_v8 }
  0x9f   :  { %254 = vtanh.f32 %v75_v7 }
  0xa0   :  { %256 = vtanh.f32 %v72_v6 }
  0xa1   :  { %258 = vtanh.f32 %v69_v5 }
  0xa4   :  { %v253_v9 = vpop.eup %252 }
  0xa5   :  { %114 = vmatpush.msra.mxu1 %v253_v9  ;;  %240 = vmatpush.msra.mxu3 %v253_v9  ;;  %v255_v10 = vpop.eup %254 }
  0xa6   :  { %v257_v11 = vpop.eup %256 }
  0xa7   :  { %115 = vmatpush.msra.mxu1 %v255_v10  ;;  %241 = vmatpush.msra.mxu3 %v255_v10  ;;  %v259_v14 = vpop.eup %258 }
  0xa9   :  { %116 = vmatpush.msra.mxu1 %v257_v11  ;;  %242 = vmatpush.msra.mxu3 %v257_v11 }
  0xab   :  { %117 = vmatpush.msra.mxu1 %v259_v14  ;;  %243 = vmatpush.msra.mxu3 %v259_v14 }
  0xac   :  { %231 = vmatmul.msk.f32.vlgmr.msra.gmra.mxu1 %vm89_vm1, %v85_v12  ;;  %234 = vmatmul.msk.f32.vlgmr.msra.gmra.mxu3 %vm89_vm1, %v88_v13 }
  0xb4   :  { %232 = vmatmul.msk.f32.gmra.mxu1 %vm89_vm1, %v86_v15 }
  0xbc   :  { %233 = vmatmul.msk.f32.gmra.mxu1 %vm89_vm1, %v87_v16 }
 0x129   :  { %v119_v17 = vpop.f32.mrf.mxu1 }
 0x12f   :  { %v128_v18 = vpop.f32.mrf.mxu3 }
 0x130   :  { %260 = vtanh.f32 %v128_v18 }
 0x131   :  { %v122_v19 = vpop.f32.mrf.mxu1 }
 0x136   :  { %v261_v20 = vpop.eup %260 }
 0x137   :  { %164 = vmatpush.msra.mxu2 %v261_v20  ;;  %244 = vmatpush.msrb.mxu3 %v261_v20 }
 0x139   :  { %v125_v21 = vpop.f32.mrf.mxu1 }
 0x13a   :  { %262 = vtanh.f32 %v125_v21 }
 0x13b   :  { %264 = vtanh.f32 %v122_v19 }
 0x13c   :  { %266 = vtanh.f32 %v119_v17 }
 0x140   :  { %v263_v22 = vpop.eup %262 }
 0x141   :  { %165 = vmatpush.msra.mxu2 %v263_v22  ;;  %245 = vmatpush.msrb.mxu3 %v263_v22  ;;  %v265_v23 = vpop.eup %264 }
 0x142   :  { %v267_v26 = vpop.eup %266 }
 0x143   :  { %166 = vmatpush.msra.mxu2 %v265_v23  ;;  %246 = vmatpush.msrb.mxu3 %v265_v23 }
 0x145   :  { %167 = vmatpush.msra.mxu2 %v267_v26  ;;  %247 = vmatpush.msrb.mxu3 %v267_v26 }
 0x146   :  { %235 = vmatmul.msk.f32.vlgmr.msra.gmra.mxu2 %vm89_vm1, %v136_v24  ;;  %238 = vmatmul.msk.f32.vlgmr.msrb.gmra.mxu3 %vm89_vm1, %v139_v25 }
 0x14e   :  { %236 = vmatmul.msk.f32.gmra.mxu2 %vm89_vm1, %v137_v27 }
 0x156   :  { %237 = vmatmul.msk.f32.gmra.mxu2 %vm89_vm1, %v138_v28 }
 0x1c9   :  { %v169_v29 = vpop.f32.mrf.mxu2  ;;  %v178_v30 = vpop.f32.mrf.mxu3 }
 0x1ca   :  { %268 = vtanh.f32 %v178_v30 }
 0x1d0   :  { %v269_v31 = vpop.eup %268 }
 0x1d1   :  { %v172_v32 = vpop.f32.mrf.mxu2  ;;  %201 = vmatpush.msra.mxu3 %v269_v31 }
 0x1d9   :  { %v175_v33 = vpop.f32.mrf.mxu2 }
 0x1da   :  { %270 = vtanh.f32 %v175_v33 }
 0x1db   :  { %272 = vtanh.f32 %v172_v32 }
 0x1dc   :  { %274 = vtanh.f32 %v169_v29 }
 0x1e0   :  { %v271_v34 = vpop.eup %270 }
 0x1e1   :  { %202 = vmatpush.msra.mxu3 %v271_v34  ;;  %v273_v35 = vpop.eup %272 }
 0x1e2   :  { %v275_v37 = vpop.eup %274 }
 0x1e3   :  { %203 = vmatpush.msra.mxu3 %v273_v35 }
 0x1e5   :  { %204 = vmatpush.msra.mxu3 %v275_v37 }
 0x1e6   :  { %239 = vmatmul.msk.f32.vlgmr.msra.gmra.mxu3 %vm89_vm1, %v185_v36 }
 0x269   :  { %v206_v38 = vpop.f32.mrf.mxu3 }
 0x26a   :  { %209 = vst [vmem:[#allocation5] sm:$0x1] %v206_v38 }
 0x26b   :  { %220 = dma.vmem_to_hbm [thread:$0]  %s216_s6, 16, %s218_s9, [#allocation4]  }
 0x26c   :  { %326 = dma.done.wait [#allocation4], 16  }
 0x26d   :  { %327 = vsyncadd [#allocation4], 4294967280 }
 0x26e   :  { %225 = vsyncpa [#allocation3], 1 }
 0x26f   :  { %226 = vsyncpa [#allocation4], 1 }

</bundles_post_ra>
